<compile_context>
chip_gen: v6e
topology: v6e:2x2x1
jax: 0.10.0
libtpu: 0.0.40
codegen_flags: <defaults>
</compile_context>

<pallas_src>
import jax
import jax.numpy as jnp
from jax.experimental import pallas as pl
from jax.experimental.pallas import tpu as pltpu


def _round_up(x, m):
    return (x + m - 1) // m * m


def _gcn_fused_kernel(adj_ref, x_ref, w0_ref, wr_ref, b_ref, out_ref):
    """Whole GCN forward in one kernel invocation; layer loop unrolled."""
    n_layers = b_ref.shape[0]

    adj = adj_ref[...]  # bf16, stays VMEM-resident; feeds every aggregation

    # Layer 0 (input width nfeat_pad): h = adj @ (x0 @ W0) + b0, f32 accumulation.
    xw = jnp.dot(x_ref[...], w0_ref[...], preferred_element_type=jnp.float32)
    h = jnp.dot(adj, xw.astype(jnp.bfloat16),
                preferred_element_type=jnp.float32) + b_ref[0]

    # Layers 1 .. L-1 (hidden width hid_pad), fully unrolled at trace time.
    # ReLU applies to every layer except the last (last_layer=True in torch).
    for i in range(1, n_layers):
        x = jnp.maximum(h, 0.0).astype(jnp.bfloat16)  # bf16 carried activation
        xw = jnp.dot(x, wr_ref[i - 1], preferred_element_type=jnp.float32)
        h = jnp.dot(adj, xw.astype(jnp.bfloat16),
                    preferred_element_type=jnp.float32) + b_ref[i]

    out_ref[...] = h.astype(out_ref.dtype)


def gcn_forward(x, adj, params):
    """GCN.forward((x, adj)) with default flags (no norm / input / output layer)."""
    n_layers = len(params)
    n, nfeat = x.shape
    nclass = params[-1][0].shape[1]

    # Hidden/carried width covers every layer output and every layer>=1 input.
    hid_dims = [w.shape[1] for w, _ in params] + [w.shape[0] for w, _ in params[1:]]
    hid_pad = _round_up(max(hid_dims + [128]), 128)   # lane-dense hidden width
    f_in_pad = _round_up(max(nfeat, 128), 128)        # layer-0 input width only

    n_pad = _round_up(max(n, 128), 128)
    if n_pad > 256:                                   # 256-wide MXU contraction (v6e/v7x)
        n_pad = _round_up(n_pad, 256)

    bf16, f32 = 2, 4

    # Zero-padded bf16 operands (padded rows/cols are zero -> real rows unchanged;
    # padded rows only ever accumulate relu(b) and never feed real rows because
    # adj's padded columns are zero).
    adj_p = jnp.zeros((n_pad, n_pad), jnp.bfloat16).at[:n, :n].set(
        adj.astype(jnp.bfloat16))
    x_p = jnp.zeros((n_pad, f_in_pad), jnp.bfloat16).at[:n, :nfeat].set(
        x.astype(jnp.bfloat16))

    w0, b0 = params[0]
    w0_p = jnp.zeros((f_in_pad, hid_pad), jnp.bfloat16).at[
        :w0.shape[0], :w0.shape[1]].set(w0.astype(jnp.bfloat16))

    n_rest = max(n_layers - 1, 1)  # keep a dummy block when n_layers == 1
    wr_p = jnp.zeros((n_rest, hid_pad, hid_pad), jnp.bfloat16)
    for i, (w, _) in enumerate(params[1:]):
        fi, fo = w.shape
        wr_p = wr_p.at[i, :fi, :fo].set(w.astype(jnp.bfloat16))

    b_p = jnp.zeros((n_layers, 1, hid_pad), jnp.float32)
    for i, (_, b) in enumerate(params):
        bb = b.reshape(1, -1).astype(jnp.float32)
        b_p = b_p.at[i, :1, :bb.shape[1]].set(bb)

    # Resident VMEM footprint: single copy of every operand (no pipelining)
    # plus the kernel's live temporaries (xw f32 + bf16 copy, h f32, bf16 carry).
    vmem_needed = (
        n_pad * n_pad * bf16            # adj
        + n_pad * f_in_pad * bf16       # x0
        + f_in_pad * hid_pad * bf16     # W0
        + n_rest * hid_pad * hid_pad * bf16  # W_1..L-1
        + n_layers * hid_pad * f32      # biases
        + n_pad * hid_pad * f32         # output
        + n_pad * hid_pad * (f32 + bf16 + f32 + bf16)  # xw(f32,bf16), h, carry
    )

    # Per-generation VMEM ceiling with headroom for Mosaic internal scratch:
    # ~56 MiB usable on v7x (64 MiB physical), ~120 MiB on v5e/v6e (128 MiB).
    try:
        info = pltpu.get_tpu_info()
        vmem_cap = int(getattr(info, "vmem_capacity_bytes", 64 * 1024 * 1024))
    except Exception:  # pragma: no cover - conservative fallback
        vmem_cap = 64 * 1024 * 1024
    vmem_limit = int(min(max(int(1.25 * vmem_needed), 32 * 1024 * 1024),
                         vmem_cap - 8 * 1024 * 1024))

    flops = (2 * n_pad * f_in_pad * hid_pad + 2 * n_pad * n_pad * hid_pad) + \
            (n_layers - 1) * (2 * n_pad * hid_pad * hid_pad + 2 * n_pad * n_pad * hid_pad)
    bytes_accessed = (adj_p.size * bf16 + x_p.size * bf16 + w0_p.size * bf16
                      + wr_p.size * bf16 + b_p.size * f32 + n_pad * hid_pad * f32)

    vmem_spec = pl.BlockSpec(memory_space=pltpu.MemorySpace.VMEM)
    out_p = pl.pallas_call(
        _gcn_fused_kernel,
        out_shape=jax.ShapeDtypeStruct((n_pad, hid_pad), jnp.float32),
        in_specs=[vmem_spec, vmem_spec, vmem_spec, vmem_spec, vmem_spec],
        out_specs=vmem_spec,
        compiler_params=pltpu.CompilerParams(vmem_limit_bytes=vmem_limit),
        cost_estimate=pl.CostEstimate(
            flops=flops, transcendentals=0, bytes_accessed=bytes_accessed),
    )(adj_p, x_p, w0_p, wr_p, b_p)

    out = out_p[:n, :nclass].astype(jnp.float32)
    # torch: x.squeeze(1) -- only collapses if the class dim is 1
    if out.shape[1] == 1:
        out = jnp.squeeze(out, axis=1)
    return out


def _gcn_reference(x, adj, params):
    """Pure-JAX f32 reference of the same forward pass (loose sanity check)."""
    n_layers = len(params)
    h = x
    for i, (w, b) in enumerate(params):
        h = adj @ h
        h = h @ w + b
        if i != n_layers - 1:
            h = jnp.maximum(h, 0.0)
    return h


if __name__ == "__main__":
    key = jax.random.PRNGKey(0)

    # Small shapes consistent with the module: N nodes, nfeat -> nhid x4 -> nclass.
    N, nfeat, nhid, nclass, n_layers = 64, 32, 32, 8, 5

    keys = jax.random.split(key, 2 + 2 * n_layers)
    k_x, k_adj, k_ws = keys[0], keys[1], keys[2:]

    # Node features.
    x = jax.random.normal(k_x, (N, nfeat), dtype=jnp.float32)

    # Deterministic symmetric normalized adjacency with self-loops: D^-1/2 (A+I) D^-1/2.
    a = (jax.random.uniform(k_adj, (N, N)) < 0.1).astype(jnp.float32)
    a = jnp.maximum(a, a.T) + jnp.eye(N, dtype=jnp.float32)
    dinv = 1.0 / jnp.sqrt(a.sum(axis=1))
    adj = a * dinv[:, None] * dinv[None, :]

    # Layer dims: layer 0 in=nfeat (no input_layer), last layer out=nclass (no output_layer).
    dims = [nfeat] + [nhid] * (n_layers - 1) + [nclass]

    # Deterministic PyTorch-Linear-style init: U(-1/sqrt(fan_in), 1/sqrt(fan_in)).
    params = []
    for i in range(n_layers):
        f_in, f_out = dims[i], dims[i + 1]
        bound = float(1.0 / (f_in ** 0.5))
        w = jax.random.uniform(k_ws[2 * i], (f_in, f_out), jnp.float32, -bound, bound)
        b = jax.random.uniform(k_ws[2 * i + 1], (1, f_out), jnp.float32, -bound, bound)
        params.append((w, b))

    out = gcn_forward(x, adj, params)
    jax.block_until_ready(out)

    assert out.shape == (N, nclass) and out.dtype == jnp.float32
    assert bool(jnp.all(jnp.isfinite(out)))

    # Loose sanity check vs the f32 reference (kernel uses bf16 MXU feeds).
    ref = _gcn_reference(x, adj, params)
    scale = float(jnp.max(jnp.abs(ref))) + 1e-6
    max_err = float(jnp.max(jnp.abs(out - ref)))
    assert max_err <= 0.05 * scale + 0.05, (max_err, scale)

    print("KERNEL_OK")
</pallas_src>

<mosaic_0001>
module attributes {stable_mosaic.version = 11 : i64} {
  func.func @_gcn_fused_kernel(%arg0: memref<128x128xbf16, #tpu.memory_space<vmem>>, %arg1: memref<128x128xbf16, #tpu.memory_space<vmem>>, %arg2: memref<128x128xbf16, #tpu.memory_space<vmem>>, %arg3: memref<4x128x128xbf16, #tpu.memory_space<vmem>>, %arg4: memref<5x1x128xf32, #tpu.memory_space<vmem>>, %arg5: memref<128x128xf32, #tpu.memory_space<vmem>>) attributes {dimension_semantics = [], scalar_prefetch = 0 : i64, scratch_operands = 0 : i64, tpu.core_type = #tpu.core_type<tc>} {
    %c0 = arith.constant 0 : index
    %c0_0 = arith.constant 0 : index
    %0 = vector.load %arg0[%c0, %c0_0] : memref<128x128xbf16, #tpu.memory_space<vmem>>, vector<128x128xbf16>
    %c0_1 = arith.constant 0 : index
    %c0_2 = arith.constant 0 : index
    %1 = vector.load %arg1[%c0_1, %c0_2] : memref<128x128xbf16, #tpu.memory_space<vmem>>, vector<128x128xbf16>
    %c0_3 = arith.constant 0 : index
    %c0_4 = arith.constant 0 : index
    %2 = vector.load %arg2[%c0_3, %c0_4] : memref<128x128xbf16, #tpu.memory_space<vmem>>, vector<128x128xbf16>
    %cst = arith.constant dense<0.000000e+00> : vector<128x128xf32>
    %3 = tpu.matmul %1, %2, %cst {dimension_numbers = #tpu.dot_dimension_numbers<[1], [0], [0], [1], [0, 0, 1, 1], [], []>} : vector<128x128xbf16>, vector<128x128xbf16>, vector<128x128xf32> -> vector<128x128xf32>
    %4 = arith.truncf %3 : vector<128x128xf32> to vector<128x128xbf16>
    %cst_5 = arith.constant dense<0.000000e+00> : vector<128x128xf32>
    %5 = tpu.matmul %0, %4, %cst_5 {dimension_numbers = #tpu.dot_dimension_numbers<[1], [0], [0], [1], [0, 0, 1, 1], [], []>} : vector<128x128xbf16>, vector<128x128xbf16>, vector<128x128xf32> -> vector<128x128xf32>
    %c0_6 = arith.constant 0 : index
    %c0_7 = arith.constant 0 : index
    %c0_8 = arith.constant 0 : index
    %6 = vector.load %arg4[%c0_6, %c0_7, %c0_8] : memref<5x1x128xf32, #tpu.memory_space<vmem>>, vector<1x1x128xf32>
    %7 = vector.shape_cast %6 : vector<1x1x128xf32> to vector<1x128xf32>
    %8 = vector.broadcast %7 : vector<1x128xf32> to vector<128x128xf32>
    %9 = arith.addf %5, %8 : vector<128x128xf32>
    %cst_9 = arith.constant 0.000000e+00 : f32
    %10 = vector.broadcast %cst_9 : f32 to vector<128x128xf32>
    %11 = arith.maximumf %9, %10 : vector<128x128xf32>
    %12 = arith.truncf %11 : vector<128x128xf32> to vector<128x128xbf16>
    %c0_10 = arith.constant 0 : index
    %c0_11 = arith.constant 0 : index
    %c0_12 = arith.constant 0 : index
    %13 = vector.load %arg3[%c0_10, %c0_11, %c0_12] : memref<4x128x128xbf16, #tpu.memory_space<vmem>>, vector<1x128x128xbf16>
    %14 = vector.shape_cast %13 : vector<1x128x128xbf16> to vector<128x128xbf16>
    %cst_13 = arith.constant dense<0.000000e+00> : vector<128x128xf32>
    %15 = tpu.matmul %12, %14, %cst_13 {dimension_numbers = #tpu.dot_dimension_numbers<[1], [0], [0], [1], [0, 0, 1, 1], [], []>} : vector<128x128xbf16>, vector<128x128xbf16>, vector<128x128xf32> -> vector<128x128xf32>
    %16 = arith.truncf %15 : vector<128x128xf32> to vector<128x128xbf16>
    %cst_14 = arith.constant dense<0.000000e+00> : vector<128x128xf32>
    %17 = tpu.matmul %0, %16, %cst_14 {dimension_numbers = #tpu.dot_dimension_numbers<[1], [0], [0], [1], [0, 0, 1, 1], [], []>} : vector<128x128xbf16>, vector<128x128xbf16>, vector<128x128xf32> -> vector<128x128xf32>
    %c1 = arith.constant 1 : index
    %c0_15 = arith.constant 0 : index
    %c0_16 = arith.constant 0 : index
    %18 = vector.load %arg4[%c1, %c0_15, %c0_16] : memref<5x1x128xf32, #tpu.memory_space<vmem>>, vector<1x1x128xf32>
    %19 = vector.shape_cast %18 : vector<1x1x128xf32> to vector<1x128xf32>
    %20 = vector.broadcast %19 : vector<1x128xf32> to vector<128x128xf32>
    %21 = arith.addf %17, %20 : vector<128x128xf32>
    %cst_17 = arith.constant 0.000000e+00 : f32
    %22 = vector.broadcast %cst_17 : f32 to vector<128x128xf32>
    %23 = arith.maximumf %21, %22 : vector<128x128xf32>
    %24 = arith.truncf %23 : vector<128x128xf32> to vector<128x128xbf16>
    %c1_18 = arith.constant 1 : index
    %c0_19 = arith.constant 0 : index
    %c0_20 = arith.constant 0 : index
    %25 = vector.load %arg3[%c1_18, %c0_19, %c0_20] : memref<4x128x128xbf16, #tpu.memory_space<vmem>>, vector<1x128x128xbf16>
    %26 = vector.shape_cast %25 : vector<1x128x128xbf16> to vector<128x128xbf16>
    %cst_21 = arith.constant dense<0.000000e+00> : vector<128x128xf32>
    %27 = tpu.matmul %24, %26, %cst_21 {dimension_numbers = #tpu.dot_dimension_numbers<[1], [0], [0], [1], [0, 0, 1, 1], [], []>} : vector<128x128xbf16>, vector<128x128xbf16>, vector<128x128xf32> -> vector<128x128xf32>
    %28 = arith.truncf %27 : vector<128x128xf32> to vector<128x128xbf16>
    %cst_22 = arith.constant dense<0.000000e+00> : vector<128x128xf32>
    %29 = tpu.matmul %0, %28, %cst_22 {dimension_numbers = #tpu.dot_dimension_numbers<[1], [0], [0], [1], [0, 0, 1, 1], [], []>} : vector<128x128xbf16>, vector<128x128xbf16>, vector<128x128xf32> -> vector<128x128xf32>
    %c2 = arith.constant 2 : index
    %c0_23 = arith.constant 0 : index
    %c0_24 = arith.constant 0 : index
    %30 = vector.load %arg4[%c2, %c0_23, %c0_24] : memref<5x1x128xf32, #tpu.memory_space<vmem>>, vector<1x1x128xf32>
    %31 = vector.shape_cast %30 : vector<1x1x128xf32> to vector<1x128xf32>
    %32 = vector.broadcast %31 : vector<1x128xf32> to vector<128x128xf32>
    %33 = arith.addf %29, %32 : vector<128x128xf32>
    %cst_25 = arith.constant 0.000000e+00 : f32
    %34 = vector.broadcast %cst_25 : f32 to vector<128x128xf32>
    %35 = arith.maximumf %33, %34 : vector<128x128xf32>
    %36 = arith.truncf %35 : vector<128x128xf32> to vector<128x128xbf16>
    %c2_26 = arith.constant 2 : index
    %c0_27 = arith.constant 0 : index
    %c0_28 = arith.constant 0 : index
    %37 = vector.load %arg3[%c2_26, %c0_27, %c0_28] : memref<4x128x128xbf16, #tpu.memory_space<vmem>>, vector<1x128x128xbf16>
    %38 = vector.shape_cast %37 : vector<1x128x128xbf16> to vector<128x128xbf16>
    %cst_29 = arith.constant dense<0.000000e+00> : vector<128x128xf32>
    %39 = tpu.matmul %36, %38, %cst_29 {dimension_numbers = #tpu.dot_dimension_numbers<[1], [0], [0], [1], [0, 0, 1, 1], [], []>} : vector<128x128xbf16>, vector<128x128xbf16>, vector<128x128xf32> -> vector<128x128xf32>
    %40 = arith.truncf %39 : vector<128x128xf32> to vector<128x128xbf16>
    %cst_30 = arith.constant dense<0.000000e+00> : vector<128x128xf32>
    %41 = tpu.matmul %0, %40, %cst_30 {dimension_numbers = #tpu.dot_dimension_numbers<[1], [0], [0], [1], [0, 0, 1, 1], [], []>} : vector<128x128xbf16>, vector<128x128xbf16>, vector<128x128xf32> -> vector<128x128xf32>
    %c3 = arith.constant 3 : index
    %c0_31 = arith.constant 0 : index
    %c0_32 = arith.constant 0 : index
    %42 = vector.load %arg4[%c3, %c0_31, %c0_32] : memref<5x1x128xf32, #tpu.memory_space<vmem>>, vector<1x1x128xf32>
    %43 = vector.shape_cast %42 : vector<1x1x128xf32> to vector<1x128xf32>
    %44 = vector.broadcast %43 : vector<1x128xf32> to vector<128x128xf32>
    %45 = arith.addf %41, %44 : vector<128x128xf32>
    %cst_33 = arith.constant 0.000000e+00 : f32
    %46 = vector.broadcast %cst_33 : f32 to vector<128x128xf32>
    %47 = arith.maximumf %45, %46 : vector<128x128xf32>
    %48 = arith.truncf %47 : vector<128x128xf32> to vector<128x128xbf16>
    %c3_34 = arith.constant 3 : index
    %c0_35 = arith.constant 0 : index
    %c0_36 = arith.constant 0 : index
    %49 = vector.load %arg3[%c3_34, %c0_35, %c0_36] : memref<4x128x128xbf16, #tpu.memory_space<vmem>>, vector<1x128x128xbf16>
    %50 = vector.shape_cast %49 : vector<1x128x128xbf16> to vector<128x128xbf16>
    %cst_37 = arith.constant dense<0.000000e+00> : vector<128x128xf32>
    %51 = tpu.matmul %48, %50, %cst_37 {dimension_numbers = #tpu.dot_dimension_numbers<[1], [0], [0], [1], [0, 0, 1, 1], [], []>} : vector<128x128xbf16>, vector<128x128xbf16>, vector<128x128xf32> -> vector<128x128xf32>
    %52 = arith.truncf %51 : vector<128x128xf32> to vector<128x128xbf16>
    %cst_38 = arith.constant dense<0.000000e+00> : vector<128x128xf32>
    %53 = tpu.matmul %0, %52, %cst_38 {dimension_numbers = #tpu.dot_dimension_numbers<[1], [0], [0], [1], [0, 0, 1, 1], [], []>} : vector<128x128xbf16>, vector<128x128xbf16>, vector<128x128xf32> -> vector<128x128xf32>
    %c4 = arith.constant 4 : index
    %c0_39 = arith.constant 0 : index
    %c0_40 = arith.constant 0 : index
    %54 = vector.load %arg4[%c4, %c0_39, %c0_40] : memref<5x1x128xf32, #tpu.memory_space<vmem>>, vector<1x1x128xf32>
    %55 = vector.shape_cast %54 : vector<1x1x128xf32> to vector<1x128xf32>
    %56 = vector.broadcast %55 : vector<1x128xf32> to vector<128x128xf32>
    %57 = arith.addf %53, %56 : vector<128x128xf32>
    %c0_41 = arith.constant 0 : index
    %c0_42 = arith.constant 0 : index
    %58 = vector.load %arg5[%c0_41, %c0_42] : memref<128x128xf32, #tpu.memory_space<vmem>>, vector<128x128xf32>
    tpu.vector_store %arg5[%c0_41, %c0_42], %57 {strides = array<i32>} : memref<128x128xf32, #tpu.memory_space<vmem>>, vector<128x128xf32>,
    return
  }
}

</mosaic_0001>

<bundles_post_ra>
// kernel: tpu_custom_call.1
= control target key start
LH: loop header
LB: loop body
LE: loop exit
PB: predicated region body
PF: predicated region fallthrough
CT: control target
= control target key end

     0   :  { %10 = vsyncpa [#allocation3], 0  ;;  %s2563_s0 = inlined_call_operand.hbm [shape: bf16[128,128], index: 0, kind: input, shape index: {}]   ;;  %s2564_s1 = inlined_call_operand.hbm [shape: bf16[128,128], index: 1, kind: input, shape index: {}]   ;;  %s2565_s2 = inlined_call_operand.hbm [shape: bf16[128,128], index: 2, kind: input, shape index: {}]   ;;  %s2566_s3 = inlined_call_operand.hbm [shape: bf16[4,128,128], index: 3, kind: input, shape index: {}]   ;;  %s2567_s4 = inlined_call_operand.vmem [shape: f32[5,1,128], index: 4, kind: input, shape index: {}]   ;;  %s2568_s5 = inlined_call_operand.hbm [shape: f32[128,128], index: 5, kind: output, shape index: {}]  }
   0x1   :  { %11 = vsyncpa [#allocation6], 0 }
   0x2   :  { %12 = vsyncpa [#allocation9], 0 }
   0x3   :  { %13 = vsyncpa [#allocation4], 0  ;;  %s2433_s18 = smov [#allocation5]   ;;  %s2434_s20 = smov [#allocation2]  }
   0x4   :  { %s31_s19 = sshll.u32 %s2433_s18, 4  ;;  %s19_s21 = sshll.u32 %s2434_s20, 4  ;;  %s32_s19 = int_to_ptr.vmem [resolvable:$true] %s31_s19  ;;  %s20_s21 = int_to_ptr.vmem [resolvable:$true] %s19_s21 }
   0x5   :  { %s2333_s22 = scalar_lea.vmem %s32_s19, 1024  ;;  %p2338_p1 = scmp.lt.s32.totalorder %s32_s19, %s32_s19 }
   0x6   :  { %p2334_p0 = scmp.ne.s32.totalorder %s32_s19, %s2333_s22  ;;  %p2339_p2 = scmp.lt.s32.totalorder %s2333_s22, %s2333_s22 }
   0x8   :  { %p2340_p3 = por %p2339_p2, %p2338_p1 }
   0xa   :  { %p2341_p4 = pnand %p2340_p3, %p2334_p0 }
   0xc   :  { %2344 = shalt.err (!%p2341_p4)
}
   0xd   :  { %s2435_s23 = smov 64   ;;  %s2436_s24 = smov 4  }
   0xe   :  { %37 = dma.hbm_to_vmem [thread:$0]  %s2564_s1, 1024, %s32_s19, [#allocation6], %s2435_s23, %s2435_s23, %s2436_s24  }
   0xf   :  { %s2353_s27 = scalar_lea.vmem %s20_s21, 1024  ;;  %p2358_p6 = scmp.lt.s32.totalorder %s20_s21, %s20_s21 }
  0x10   :  { %p2354_p5 = scmp.ne.s32.totalorder %s20_s21, %s2353_s27  ;;  %p2359_p7 = scmp.lt.s32.totalorder %s2353_s27, %s2353_s27 }
  0x12   :  { %p2360_p8 = por %p2359_p7, %p2358_p6 }
  0x14   :  { %p2361_p9 = pnand %p2360_p8, %p2354_p5 }
  0x16   :  { %2364 = shalt.err (!%p2361_p9)
}
  0x17   :  { %25 = dma.hbm_to_vmem [thread:$0]  %s2563_s0, 1024, %s20_s21, [#allocation3], %s2435_s23, %s2435_s23, %s2436_s24  }
  0x18   :  { %s2437_s30 = smov [#allocation7]   ;;  %s2438_s7 = smov [#allocation8]  }
  0x19   :  { %s43_s6 = sshll.u32 %s2437_s30, 4  ;;  %s55_s8 = sshll.u32 %s2438_s7, 4  ;;  %s44_s6 = int_to_ptr.vmem [resolvable:$true] %s43_s6  ;;  %s56_s8 = int_to_ptr.vmem [resolvable:$true] %s55_s8 }
  0x1a   :  { %s2373_s1 = scalar_lea.vmem %s44_s6, 1024  ;;  %p2378_p11 = scmp.lt.s32.totalorder %s44_s6, %s44_s6 }
  0x1b   :  { %p2374_p10 = scmp.ne.s32.totalorder %s44_s6, %s2373_s1  ;;  %p2379_p12 = scmp.lt.s32.totalorder %s2373_s1, %s2373_s1 }
  0x1d   :  { %p2380_p13 = por %p2379_p12, %p2378_p11 }
  0x1f   :  { %p2381_p0 = pnand %p2380_p13, %p2374_p10 }
  0x21   :  { %2384 = shalt.err (!%p2381_p0)
}
  0x22   :  { %49 = dma.hbm_to_vmem [thread:$0]  %s2565_s2, 1024, %s44_s6, [#allocation6], %s2435_s23, %s2435_s23, %s2436_s24  }
  0x23   :  { %s2393_s0 = scalar_lea.vmem %s56_s8, 4096  ;;  %p2398_p2 = scmp.lt.s32.totalorder %s56_s8, %s56_s8 }
  0x24   :  { %p2394_p1 = scmp.ne.s32.totalorder %s56_s8, %s2393_s0  ;;  %p2399_p3 = scmp.lt.s32.totalorder %s2393_s0, %s2393_s0 }
  0x26   :  { %p2400_p4 = por %p2399_p3, %p2398_p2 }
  0x28   :  { %p2401_p5 = pnand %p2400_p4, %p2394_p1 }
  0x2a   :  { %2404 = shalt.err (!%p2401_p5)
}
  0x2b   :  { %61 = dma.hbm_to_vmem [thread:$0]  %s2566_s3, 4096, %s56_s8, [#allocation9], %s2435_s23, %s2435_s23, %s2436_s24  }
  0x2c   :  { %2425 = dma.done.wait [#allocation3], 1024  }
  0x2d   :  { %2426 = vsyncadd [#allocation3], 4294966272 }
  0x2e   :  { %2427 = dma.done.wait [#allocation6], 2048  }
  0x2f   :  { %2428 = vsyncadd [#allocation6], 4294965248 }
  0x30   :  { %2429 = dma.done.wait [#allocation9], 4096  }
  0x31   :  { %2430 = vsyncadd [#allocation9], 4294963200  ;;  %v2262_v0 = vld [vmem:[#allocation7 + $0x38] sm:$0xff]   ;;  %v2263_v1 = vld [vmem:[#allocation7 + $0x30] sm:$0xff]  }
  0x32   :  { %1933 = vmatprep.subr.bf16.mxu0 %v2262_v0  ;;  %v2264_v2 = vld [vmem:[#allocation7 + $0x28] sm:$0xff]   ;;  %v2265_v3 = vld [vmem:[#allocation7 + $0x20] sm:$0xff]   ;;  %v2266_v5 = vld [vmem:[#allocation7 + $0x18] sm:$0xff]  }
  0x33   :  { %1934 = vmatpush3.bf16.msra.mxu0 %v2262_v0  ;;  %v2270_v4 = vld [vmem:[#allocation5] sm:$0xff]   ;;  %v2267_v6 = vld [vmem:[#allocation7 + $0x10] sm:$0xff]   ;;  %v2268_v7 = vld [vmem:[#allocation7 + $0x8] sm:$0xff]  }
  0x34   :  { %1935 = vmatprep.subr.bf16.mxu0 %v2263_v1  ;;  %1949 = vmatprep.mubr.bf16.mxu0 %v2270_v4  ;;  %v2269_v8 = vld [vmem:[#allocation7] sm:$0xff]   ;;  %v2271_v9 = vld [vmem:[#allocation5 + $0x8] sm:$0xff]   ;;  %v2272_v10 = vld [vmem:[#allocation5 + $0x10] sm:$0xff]  }
  0x35   :  { %v2273_v11 = vld [vmem:[#allocation5 + $0x18] sm:$0xff]   ;;  %v2274_v12 = vld [vmem:[#allocation5 + $0x20] sm:$0xff]   ;;  %v2275_v13 = vld [vmem:[#allocation5 + $0x28] sm:$0xff]  }
  0x36   :  { %v2276_v14 = vld [vmem:[#allocation5 + $0x30] sm:$0xff]   ;;  %v2277_v15 = vld [vmem:[#allocation5 + $0x38] sm:$0xff]   ;;  %v2496_v16 = vld [vmem:[#allocation2] sm:$0xff]  }
  0x37   :  { %1936 = vmatpush3.bf16.msra.mxu0 %v2263_v1  ;;  %1981 = vmatprep.mubr.bf16.mxu1 %v2496_v16  ;;  %v2286_v17 = vld [vmem:[#allocation8 + $0x38] sm:$0xff]   ;;  %v2287_v18 = vld [vmem:[#allocation8 + $0x30] sm:$0xff]   ;;  %v2288_v19 = vld [vmem:[#allocation8 + $0x28] sm:$0xff]  }
  0x38   :  { %1937 = vmatprep.subr.bf16.mxu0 %v2264_v2  ;;  %v2289_v20 = vld [vmem:[#allocation8 + $0x20] sm:$0xff]   ;;  %v2290_v21 = vld [vmem:[#allocation8 + $0x18] sm:$0xff]   ;;  %v2499_v46 = vld [vmem:[#allocation2 + $0x8] sm:$0xff]  }
  0x39   :  { %v2501_v47 = vld [vmem:[#allocation2 + $0x10] sm:$0xff]   ;;  %v2505_v48 = vld [vmem:[#allocation2 + $0x18] sm:$0xff]   ;;  %v2507_v49 = vld [vmem:[#allocation2 + $0x20] sm:$0xff]  }
  0x3a   :  { %v2511_v50 = vld [vmem:[#allocation2 + $0x28] sm:$0xff]   ;;  %v2513_v51 = vld [vmem:[#allocation2 + $0x30] sm:$0xff]   ;;  %v2517_v52 = vld [vmem:[#allocation2 + $0x38] sm:$0xff]  }
  0x3b   :  { %1938 = vmatpush3.bf16.msra.mxu0 %v2264_v2  ;;  %v2291_v53 = vld [vmem:[#allocation8 + $0x10] sm:$0xff]   ;;  %v2292_v54 = vld [vmem:[#allocation8 + $0x8] sm:$0xff]   ;;  %v2293_v55 = vld [vmem:[#allocation8] sm:$0xff]  }
  0x3c   :  { %1939 = vmatprep.subr.bf16.mxu0 %v2265_v3  ;;  %v1724_v58 = vld [vmem:[%s2567_s4] ss:$0 sm:$0xff] }
  0x3f   :  { %1940 = vmatpush3.bf16.msra.mxu0 %v2265_v3 }
  0x40   :  { %1941 = vmatprep.subr.bf16.mxu0 %v2266_v5 }
  0x43   :  { %1942 = vmatpush3.bf16.msra.mxu0 %v2266_v5 }
  0x44   :  { %1943 = vmatprep.subr.bf16.mxu0 %v2267_v6 }
  0x47   :  { %1944 = vmatpush3.bf16.msra.mxu0 %v2267_v6 }
  0x48   :  { %1945 = vmatprep.subr.bf16.mxu0 %v2268_v7 }
  0x4b   :  { %1946 = vmatpush3.bf16.msra.mxu0 %v2268_v7 }
  0x4c   :  { %1947 = vmatprep.subr.bf16.mxu0 %v2269_v8 }
  0x4f   :  { %1948 = vmatpush3.bf16.msra.mxu0 %v2269_v8 }
  0x50   :  { %1997 = vmatprep.subr.bf16.mxu0 %v2286_v17 }
  0x52   :  { %1950 = vmatmul.mubr.bf16.vlgmr.msra.gmra.mxu0 %v2271_v9 }
  0x53   :  { %1953 = vmatprep.mubr.bf16.mxu0 %v2272_v10  ;;  %1998 = vmatpush3.bf16.msra.mxu0 %v2286_v17 }
  0x54   :  { %1999 = vmatprep.subr.bf16.mxu0 %v2287_v18 }
  0x57   :  { %2000 = vmatpush3.bf16.msra.mxu0 %v2287_v18 }
  0x58   :  { %2001 = vmatprep.subr.bf16.mxu0 %v2288_v19 }
  0x5a   :  { %1954 = vmatmul.mubr.bf16.gmra.mxu0 %v2273_v11 }
  0x5b   :  { %1957 = vmatprep.mubr.bf16.mxu0 %v2274_v12  ;;  %2002 = vmatpush3.bf16.msra.mxu0 %v2288_v19 }
  0x5c   :  { %2003 = vmatprep.subr.bf16.mxu0 %v2289_v20 }
  0x5f   :  { %2004 = vmatpush3.bf16.msra.mxu0 %v2289_v20 }
  0x60   :  { %2005 = vmatprep.subr.bf16.mxu0 %v2290_v21 }
  0x62   :  { %1958 = vmatmul.mubr.bf16.gmra.mxu0 %v2275_v13 }
  0x63   :  { %1961 = vmatprep.mubr.bf16.mxu0 %v2276_v14  ;;  %2006 = vmatpush3.bf16.msra.mxu0 %v2290_v21 }
  0x64   :  { %2007 = vmatprep.subr.bf16.mxu0 %v2291_v53 }
  0x67   :  { %2008 = vmatpush3.bf16.msra.mxu0 %v2291_v53 }
  0x68   :  { %2009 = vmatprep.subr.bf16.mxu0 %v2292_v54 }
  0x6a   :  { %1962 = vmatmul.mubr.bf16.gmra.mxu0 %v2277_v15 }
  0x6b   :  { %2010 = vmatpush3.bf16.msra.mxu0 %v2292_v54 }
  0x6c   :  { %2011 = vmatprep.subr.bf16.mxu0 %v2293_v55 }
  0x6f   :  { %2012 = vmatpush3.bf16.msra.mxu0 %v2293_v55 }
 0x112   :  { %v1951_v22 = vpop.f32.mrf.mxu0 }
 0x114   :  { %v255_v23 = vpop.f32.mrf.mxu0 }
 0x116   :  { %v1952_v24 = vpop.f32.mrf.mxu0 }
 0x117   :  { %v319_v44 = vpack.c.bf16 %v1952_v24, %v1951_v22 }
 0x118   :  { %v258_v25 = vpop.f32.mrf.mxu0 }
 0x119   :  { %v318_v45 = vpack.c.bf16 %v258_v25, %v255_v23 }
 0x11a   :  { %v1955_v26 = vpop.f32.mrf.mxu0 }
 0x11c   :  { %v271_v27 = vpop.f32.mrf.mxu0 }
 0x11e   :  { %v1956_v28 = vpop.f32.mrf.mxu0 }
 0x11f   :  { %v321_v42 = vpack.c.bf16 %v1956_v28, %v1955_v26 }
 0x120   :  { %v274_v29 = vpop.f32.mrf.mxu0 }
 0x121   :  { %v320_v43 = vpack.c.bf16 %v274_v29, %v271_v27 }
 0x122   :  { %v1959_v30 = vpop.f32.mrf.mxu0 }
 0x124   :  { %v287_v31 = vpop.f32.mrf.mxu0 }
 0x126   :  { %v1960_v32 = vpop.f32.mrf.mxu0 }
 0x127   :  { %v323_v40 = vpack.c.bf16 %v1960_v32, %v1959_v30 }
 0x128   :  { %v290_v33 = vpop.f32.mrf.mxu0 }
 0x129   :  { %v322_v41 = vpack.c.bf16 %v290_v33, %v287_v31 }
 0x12a   :  { %v1963_v34 = vpop.f32.mrf.mxu0 }
 0x12c   :  { %v303_v35 = vpop.f32.mrf.mxu0 }
 0x12e   :  { %v1964_v36 = vpop.f32.mrf.mxu0 }
 0x12f   :  { %v325_v37 = vpack.c.bf16 %v1964_v36, %v1963_v34 }
 0x130   :  { %v306_v38 = vpop.f32.mrf.mxu0 }
 0x131   :  { %v324_v39 = vpack.c.bf16 %v306_v38, %v303_v35  ;;  %1965 = vmatprep.subr.bf16.mxu1 %v325_v37 }
 0x132   :  { %1966 = vmatpush3.bf16.msra.mxu1 %v325_v37 }
 0x133   :  { %1967 = vmatprep.subr.bf16.mxu1 %v324_v39 }
 0x136   :  { %1968 = vmatpush3.bf16.msra.mxu1 %v324_v39 }
 0x137   :  { %1969 = vmatprep.subr.bf16.mxu1 %v323_v40 }
 0x13a   :  { %1970 = vmatpush3.bf16.msra.mxu1 %v323_v40 }
 0x13b   :  { %1971 = vmatprep.subr.bf16.mxu1 %v322_v41 }
 0x13e   :  { %1972 = vmatpush3.bf16.msra.mxu1 %v322_v41 }
 0x13f   :  { %1973 = vmatprep.subr.bf16.mxu1 %v321_v42 }
 0x142   :  { %1974 = vmatpush3.bf16.msra.mxu1 %v321_v42 }
 0x143   :  { %1975 = vmatprep.subr.bf16.mxu1 %v320_v43 }
 0x146   :  { %1976 = vmatpush3.bf16.msra.mxu1 %v320_v43 }
 0x147   :  { %1977 = vmatprep.subr.bf16.mxu1 %v319_v44 }
 0x14a   :  { %1978 = vmatpush3.bf16.msra.mxu1 %v319_v44 }
 0x14b   :  { %1979 = vmatprep.subr.bf16.mxu1 %v318_v45 }
 0x14e   :  { %1980 = vmatpush3.bf16.msra.mxu1 %v318_v45 }
 0x151   :  { %1982 = vmatmul.mubr.bf16.vlgmr.msra.gmra.mxu1 %v2499_v46 }
 0x152   :  { %1985 = vmatprep.mubr.bf16.mxu1 %v2501_v47 }
 0x159   :  { %1986 = vmatmul.mubr.bf16.gmra.mxu1 %v2505_v48 }
 0x15a   :  { %1989 = vmatprep.mubr.bf16.mxu1 %v2507_v49 }
 0x161   :  { %1990 = vmatmul.mubr.bf16.gmra.mxu1 %v2511_v50 }
 0x162   :  { %1993 = vmatprep.mubr.bf16.mxu1 %v2513_v51 }
 0x169   :  { %1994 = vmatmul.mubr.bf16.gmra.mxu1 %v2517_v52 }
 0x16a   :  { %2045 = vmatprep.mubr.bf16.mxu1 %v2496_v16 }
 0x211   :  { %v1983_v56 = vpop.f32.mrf.mxu1 }
 0x212   :  { %v424_v62 = vadd.f32 %v1983_v56, %v1724_v58 }
 0x213   :  { %v415_v57 = vpop.f32.mrf.mxu1 }
 0x214   :  { %v416_v60 = vadd.f32 %v1724_v58, %v415_v57  ;;  %v480_v5 = vmax.f32 %v424_v62, 0.0  ;;  %v2294_v57 = vld [vmem:[#allocation8 + $0x78] sm:$0xff]  }
 0x215   :  { %v1984_v59 = vpop.f32.mrf.mxu1  ;;  %2061 = vmatprep.subr.bf16.mxu0 %v2294_v57 }
 0x216   :  { %v427_v61 = vadd.f32 %v1984_v59, %v1724_v58  ;;  %v478_v3 = vmax.f32 %v416_v60, 0.0  ;;  %v2295_v59 = vld [vmem:[#allocation8 + $0x70] sm:$0xff]   ;;  %v2296_v60 = vld [vmem:[#allocation8 + $0x68] sm:$0xff]  }
 0x217   :  { %v418_v63 = vpop.f32.mrf.mxu1 }
 0x218   :  { %v419_v0 = vadd.f32 %v1724_v58, %v418_v63  ;;  %v481_v1 = vmax.f32 %v427_v61, 0.0  ;;  %v2297_v61 = vld [vmem:[#allocation8 + $0x60] sm:$0xff]  }
 0x219   :  { %v1987_v2 = vpop.f32.mrf.mxu1 }
 0x21a   :  { %v479_v4 = vmax.f32 %v419_v0, 0.0  ;;  %v495_v8 = vpack.c.bf16 %v481_v1, %v480_v5  ;;  %v440_v12 = vadd.f32 %v1987_v2, %v1724_v58 }
 0x21b   :  { %v431_v6 = vpop.f32.mrf.mxu1 }
 0x21c   :  { %v494_v7 = vpack.c.bf16 %v479_v4, %v478_v3  ;;  %v432_v10 = vadd.f32 %v1724_v58, %v431_v6  ;;  %v484_v20 = vmax.f32 %v440_v12, 0.0 }
 0x21d   :  { %v1988_v9 = vpop.f32.mrf.mxu1 }
 0x21e   :  { %v443_v11 = vadd.f32 %v1988_v9, %v1724_v58  ;;  %2013 = vmatprep.mubr.bf16.mxu0 %v494_v7  ;;  %v482_v18 = vmax.f32 %v432_v10, 0.0 }
 0x21f   :  { %v434_v13 = vpop.f32.mrf.mxu1  ;;  %2014 = vmatmul.mubr.bf16.vlgmr.msra.gmra.mxu0 %v495_v8 }
 0x220   :  { %v435_v14 = vadd.f32 %v1724_v58, %v434_v13  ;;  %v485_v15 = vmax.f32 %v443_v11, 0.0  ;;  %2062 = vmatpush3.bf16.msra.mxu0 %v2294_v57 }
 0x221   :  { %v1991_v17 = vpop.f32.mrf.mxu1  ;;  %2063 = vmatprep.subr.bf16.mxu0 %v2295_v59 }
 0x222   :  { %v483_v19 = vmax.f32 %v435_v14, 0.0  ;;  %v497_v23 = vpack.c.bf16 %v485_v15, %v484_v20  ;;  %v456_v27 = vadd.f32 %v1991_v17, %v1724_v58 }
 0x223   :  { %v447_v21 = vpop.f32.mrf.mxu1 }
 0x224   :  { %v496_v22 = vpack.c.bf16 %v483_v19, %v482_v18  ;;  %v448_v25 = vadd.f32 %v1724_v58, %v447_v21  ;;  %v488_v34 = vmax.f32 %v456_v27, 0.0  ;;  %2064 = vmatpush3.bf16.msra.mxu0 %v2295_v59 }
 0x225   :  { %v1992_v24 = vpop.f32.mrf.mxu1  ;;  %2065 = vmatprep.subr.bf16.mxu0 %v2296_v60 }
 0x226   :  { %v459_v26 = vadd.f32 %v1992_v24, %v1724_v58  ;;  %2017 = vmatprep.mubr.bf16.mxu0 %v496_v22  ;;  %v486_v32 = vmax.f32 %v448_v25, 0.0  ;;  %v2300_v24 = vld [vmem:[#allocation8 + $0x48] sm:$0xff]   ;;  %v2301_v25 = vld [vmem:[#allocation8 + $0x40] sm:$0xff]  }
 0x227   :  { %v450_v28 = vpop.f32.mrf.mxu1  ;;  %2018 = vmatmul.mubr.bf16.gmra.mxu0 %v497_v23  ;;  %v2299_v23 = vld [vmem:[#allocation8 + $0x50] sm:$0xff]  }
 0x228   :  { %v451_v29 = vadd.f32 %v1724_v58, %v450_v28  ;;  %v489_v30 = vmax.f32 %v459_v26, 0.0  ;;  %2066 = vmatpush3.bf16.msra.mxu0 %v2296_v60  ;;  %v1742_v28 = vld [vmem:[%s2567_s4 + $0x1] ss:$0 sm:$0xff] }
 0x229   :  { %v1995_v31 = vpop.f32.mrf.mxu1  ;;  %2067 = vmatprep.subr.bf16.mxu0 %v2297_v61 }
 0x22a   :  { %v487_v33 = vmax.f32 %v451_v29, 0.0  ;;  %v499_v37 = vpack.c.bf16 %v489_v30, %v488_v34  ;;  %v472_v41 = vadd.f32 %v1995_v31, %v1724_v58 }
 0x22b   :  { %v463_v35 = vpop.f32.mrf.mxu1 }
 0x22c   :  { %v498_v36 = vpack.c.bf16 %v487_v33, %v486_v32  ;;  %v464_v39 = vadd.f32 %v1724_v58, %v463_v35  ;;  %v492_v54 = vmax.f32 %v472_v41, 0.0  ;;  %2068 = vmatpush3.bf16.msra.mxu0 %v2297_v61 }
 0x22d   :  { %v1996_v38 = vpop.f32.mrf.mxu1 }
 0x22e   :  { %v475_v40 = vadd.f32 %v1996_v38, %v1724_v58  ;;  %2021 = vmatprep.mubr.bf16.mxu0 %v498_v36  ;;  %v490_v45 = vmax.f32 %v464_v39, 0.0 }
 0x22f   :  { %v466_v42 = vpop.f32.mrf.mxu1  ;;  %2022 = vmatmul.mubr.bf16.gmra.mxu0 %v499_v37 }
 0x230   :  { %v467_v43 = vadd.f32 %v1724_v58, %v466_v42  ;;  %v493_v44 = vmax.f32 %v475_v40, 0.0  ;;  %v2298_v58 = vld [vmem:[#allocation8 + $0x58] sm:$0xff]  }
 0x231   :  { %2069 = vmatprep.subr.bf16.mxu0 %v2298_v58 }
 0x232   :  { %v491_v53 = vmax.f32 %v467_v43, 0.0  ;;  %v501_v56 = vpack.c.bf16 %v493_v44, %v492_v54  ;;  %2070 = vmatpush3.bf16.msra.mxu0 %v2298_v58 }
 0x233   :  { %2071 = vmatprep.subr.bf16.mxu0 %v2299_v23 }
 0x234   :  { %v500_v55 = vpack.c.bf16 %v491_v53, %v490_v45 }
 0x236   :  { %2025 = vmatprep.mubr.bf16.mxu0 %v500_v55  ;;  %2072 = vmatpush3.bf16.msra.mxu0 %v2299_v23 }
 0x237   :  { %2026 = vmatmul.mubr.bf16.gmra.mxu0 %v501_v56  ;;  %2073 = vmatprep.subr.bf16.mxu0 %v2300_v24 }
 0x23a   :  { %2074 = vmatpush3.bf16.msra.mxu0 %v2300_v24 }
 0x23b   :  { %2075 = vmatprep.subr.bf16.mxu0 %v2301_v25 }
 0x23e   :  { %2076 = vmatpush3.bf16.msra.mxu0 %v2301_v25 }
 0x2df   :  { %v2015_v62 = vpop.f32.mrf.mxu0 }
 0x2e1   :  { %v600_v63 = vpop.f32.mrf.mxu0 }
 0x2e3   :  { %v2016_v0 = vpop.f32.mrf.mxu0 }
 0x2e4   :  { %v664_v21 = vpack.c.bf16 %v2016_v0, %v2015_v62 }
 0x2e5   :  { %v603_v1 = vpop.f32.mrf.mxu0 }
 0x2e6   :  { %v663_v22 = vpack.c.bf16 %v603_v1, %v600_v63 }
 0x2e7   :  { %v2019_v2 = vpop.f32.mrf.mxu0 }
 0x2e9   :  { %v616_v3 = vpop.f32.mrf.mxu0 }
 0x2eb   :  { %v2020_v4 = vpop.f32.mrf.mxu0 }
 0x2ec   :  { %v666_v19 = vpack.c.bf16 %v2020_v4, %v2019_v2 }
 0x2ed   :  { %v619_v5 = vpop.f32.mrf.mxu0 }
 0x2ee   :  { %v665_v20 = vpack.c.bf16 %v619_v5, %v616_v3 }
 0x2ef   :  { %v2023_v6 = vpop.f32.mrf.mxu0 }
 0x2f1   :  { %v632_v7 = vpop.f32.mrf.mxu0 }
 0x2f3   :  { %v2024_v8 = vpop.f32.mrf.mxu0 }
 0x2f4   :  { %v668_v17 = vpack.c.bf16 %v2024_v8, %v2023_v6 }
 0x2f5   :  { %v635_v9 = vpop.f32.mrf.mxu0 }
 0x2f6   :  { %v667_v18 = vpack.c.bf16 %v635_v9, %v632_v7 }
 0x2f7   :  { %v2027_v10 = vpop.f32.mrf.mxu0 }
 0x2f9   :  { %v648_v11 = vpop.f32.mrf.mxu0 }
 0x2fb   :  { %v2028_v12 = vpop.f32.mrf.mxu0 }
 0x2fc   :  { %v670_v13 = vpack.c.bf16 %v2028_v12, %v2027_v10 }
 0x2fd   :  { %v651_v14 = vpop.f32.mrf.mxu0 }
 0x2fe   :  { %v669_v15 = vpack.c.bf16 %v651_v14, %v648_v11  ;;  %2029 = vmatprep.subr.bf16.mxu1 %v670_v13 }
 0x2ff   :  { %2030 = vmatpush3.bf16.msra.mxu1 %v670_v13 }
 0x300   :  { %2031 = vmatprep.subr.bf16.mxu1 %v669_v15 }
 0x303   :  { %2032 = vmatpush3.bf16.msra.mxu1 %v669_v15 }
 0x304   :  { %2033 = vmatprep.subr.bf16.mxu1 %v668_v17 }
 0x307   :  { %2034 = vmatpush3.bf16.msra.mxu1 %v668_v17 }
 0x308   :  { %2035 = vmatprep.subr.bf16.mxu1 %v667_v18 }
 0x30b   :  { %2036 = vmatpush3.bf16.msra.mxu1 %v667_v18 }
 0x30c   :  { %2037 = vmatprep.subr.bf16.mxu1 %v666_v19 }
 0x30f   :  { %2038 = vmatpush3.bf16.msra.mxu1 %v666_v19 }
 0x310   :  { %2039 = vmatprep.subr.bf16.mxu1 %v665_v20 }
 0x313   :  { %2040 = vmatpush3.bf16.msra.mxu1 %v665_v20 }
 0x314   :  { %2041 = vmatprep.subr.bf16.mxu1 %v664_v21 }
 0x317   :  { %2042 = vmatpush3.bf16.msra.mxu1 %v664_v21 }
 0x318   :  { %2043 = vmatprep.subr.bf16.mxu1 %v663_v22 }
 0x31b   :  { %2044 = vmatpush3.bf16.msra.mxu1 %v663_v22 }
 0x31e   :  { %2046 = vmatmul.mubr.bf16.vlgmr.msra.gmra.mxu1 %v2499_v46 }
 0x31f   :  { %2049 = vmatprep.mubr.bf16.mxu1 %v2501_v47 }
 0x326   :  { %2050 = vmatmul.mubr.bf16.gmra.mxu1 %v2505_v48 }
 0x327   :  { %2053 = vmatprep.mubr.bf16.mxu1 %v2507_v49 }
 0x32e   :  { %2054 = vmatmul.mubr.bf16.gmra.mxu1 %v2511_v50 }
 0x32f   :  { %2057 = vmatprep.mubr.bf16.mxu1 %v2513_v51 }
 0x336   :  { %2058 = vmatmul.mubr.bf16.gmra.mxu1 %v2517_v52 }
 0x337   :  { %2109 = vmatprep.mubr.bf16.mxu1 %v2496_v16 }
 0x3de   :  { %v2047_v26 = vpop.f32.mrf.mxu1 }
 0x3df   :  { %v722_v32 = vadd.f32 %v2047_v26, %v1742_v28 }
 0x3e0   :  { %v713_v27 = vpop.f32.mrf.mxu1 }
 0x3e1   :  { %v714_v30 = vadd.f32 %v1742_v28, %v713_v27  ;;  %v778_v39 = vmax.f32 %v722_v32, 0.0  ;;  %v2302_v27 = vld [vmem:[#allocation8 + $0xb8] sm:$0xff]  }
 0x3e2   :  { %v2048_v29 = vpop.f32.mrf.mxu1  ;;  %2125 = vmatprep.subr.bf16.mxu0 %v2302_v27 }
 0x3e3   :  { %v725_v31 = vadd.f32 %v2048_v29, %v1742_v28  ;;  %v776_v37 = vmax.f32 %v714_v30, 0.0  ;;  %v2303_v29 = vld [vmem:[#allocation8 + $0xb0] sm:$0xff]   ;;  %v2304_v30 = vld [vmem:[#allocation8 + $0xa8] sm:$0xff]  }
 0x3e4   :  { %v716_v33 = vpop.f32.mrf.mxu1 }
 0x3e5   :  { %v717_v34 = vadd.f32 %v1742_v28, %v716_v33  ;;  %v779_v35 = vmax.f32 %v725_v31, 0.0  ;;  %v2305_v31 = vld [vmem:[#allocation8 + $0xa0] sm:$0xff]  }
 0x3e6   :  { %v2051_v36 = vpop.f32.mrf.mxu1 }
 0x3e7   :  { %v777_v38 = vmax.f32 %v717_v34, 0.0  ;;  %v793_v42 = vpack.c.bf16 %v779_v35, %v778_v39  ;;  %v738_v53 = vadd.f32 %v2051_v36, %v1742_v28 }
 0x3e8   :  { %v729_v40 = vpop.f32.mrf.mxu1 }
 0x3e9   :  { %v792_v41 = vpack.c.bf16 %v777_v38, %v776_v37  ;;  %v730_v44 = vadd.f32 %v1742_v28, %v729_v40  ;;  %v782_v61 = vmax.f32 %v738_v53, 0.0 }
 0x3ea   :  { %v2052_v43 = vpop.f32.mrf.mxu1 }
 0x3eb   :  { %v741_v45 = vadd.f32 %v2052_v43, %v1742_v28  ;;  %2077 = vmatprep.mubr.bf16.mxu0 %v792_v41  ;;  %v780_v59 = vmax.f32 %v730_v44, 0.0 }
 0x3ec   :  { %v732_v54 = vpop.f32.mrf.mxu1  ;;  %2078 = vmatmul.mubr.bf16.vlgmr.msra.gmra.mxu0 %v793_v42 }
 0x3ed   :  { %v733_v55 = vadd.f32 %v1742_v28, %v732_v54  ;;  %v783_v56 = vmax.f32 %v741_v45, 0.0  ;;  %2126 = vmatpush3.bf16.msra.mxu0 %v2302_v27 }
 0x3ee   :  { %v2055_v57 = vpop.f32.mrf.mxu1  ;;  %2127 = vmatprep.subr.bf16.mxu0 %v2303_v29 }
 0x3ef   :  { %v781_v60 = vmax.f32 %v733_v55, 0.0  ;;  %v795_v63 = vpack.c.bf16 %v783_v56, %v782_v61  ;;  %v754_v3 = vadd.f32 %v2055_v57, %v1742_v28 }
 0x3f0   :  { %v745_v58 = vpop.f32.mrf.mxu1 }
 0x3f1   :  { %v794_v62 = vpack.c.bf16 %v781_v60, %v780_v59  ;;  %v746_v1 = vadd.f32 %v1742_v28, %v745_v58  ;;  %v786_v10 = vmax.f32 %v754_v3, 0.0  ;;  %2128 = vmatpush3.bf16.msra.mxu0 %v2303_v29 }
 0x3f2   :  { %v2056_v0 = vpop.f32.mrf.mxu1  ;;  %2129 = vmatprep.subr.bf16.mxu0 %v2304_v30 }
 0x3f3   :  { %v757_v2 = vadd.f32 %v2056_v0, %v1742_v28  ;;  %2081 = vmatprep.mubr.bf16.mxu0 %v794_v62  ;;  %v784_v8 = vmax.f32 %v746_v1, 0.0  ;;  %v2308_v0 = vld [vmem:[#allocation8 + $0x88] sm:$0xff]   ;;  %v2309_v1 = vld [vmem:[#allocation8 + $0x80] sm:$0xff]  }
 0x3f4   :  { %v748_v4 = vpop.f32.mrf.mxu1  ;;  %2082 = vmatmul.mubr.bf16.gmra.mxu0 %v795_v63  ;;  %v2307_v63 = vld [vmem:[#allocation8 + $0x90] sm:$0xff]  }
 0x3f5   :  { %v749_v5 = vadd.f32 %v1742_v28, %v748_v4  ;;  %v787_v6 = vmax.f32 %v757_v2, 0.0  ;;  %2130 = vmatpush3.bf16.msra.mxu0 %v2304_v30  ;;  %v1752_v4 = vld [vmem:[%s2567_s4 + $0x2] ss:$0 sm:$0xff] }
 0x3f6   :  { %v2059_v7 = vpop.f32.mrf.mxu1  ;;  %2131 = vmatprep.subr.bf16.mxu0 %v2305_v31 }
 0x3f7   :  { %v785_v9 = vmax.f32 %v749_v5, 0.0  ;;  %v797_v13 = vpack.c.bf16 %v787_v6, %v786_v10  ;;  %v770_v18 = vadd.f32 %v2059_v7, %v1742_v28 }
 0x3f8   :  { %v761_v11 = vpop.f32.mrf.mxu1 }
 0x3f9   :  { %v796_v12 = vpack.c.bf16 %v785_v9, %v784_v8  ;;  %v762_v15 = vadd.f32 %v1742_v28, %v761_v11  ;;  %v790_v24 = vmax.f32 %v770_v18, 0.0  ;;  %2132 = vmatpush3.bf16.msra.mxu0 %v2305_v31 }
 0x3fa   :  { %v2060_v14 = vpop.f32.mrf.mxu1 }
 0x3fb   :  { %v773_v17 = vadd.f32 %v2060_v14, %v1742_v28  ;;  %2085 = vmatprep.mubr.bf16.mxu0 %v796_v12  ;;  %v788_v22 = vmax.f32 %v762_v15, 0.0 }
 0x3fc   :  { %v764_v19 = vpop.f32.mrf.mxu1  ;;  %2086 = vmatmul.mubr.bf16.gmra.mxu0 %v797_v13 }
 0x3fd   :  { %v765_v20 = vadd.f32 %v1742_v28, %v764_v19  ;;  %v791_v21 = vmax.f32 %v773_v17, 0.0  ;;  %v2306_v28 = vld [vmem:[#allocation8 + $0x98] sm:$0xff]  }
 0x3fe   :  { %2133 = vmatprep.subr.bf16.mxu0 %v2306_v28 }
 0x3ff   :  { %v789_v23 = vmax.f32 %v765_v20, 0.0  ;;  %v799_v26 = vpack.c.bf16 %v791_v21, %v790_v24  ;;  %2134 = vmatpush3.bf16.msra.mxu0 %v2306_v28 }
 0x400   :  { %2135 = vmatprep.subr.bf16.mxu0 %v2307_v63 }
 0x401   :  { %v798_v25 = vpack.c.bf16 %v789_v23, %v788_v22 }
 0x403   :  { %2089 = vmatprep.mubr.bf16.mxu0 %v798_v25  ;;  %2136 = vmatpush3.bf16.msra.mxu0 %v2307_v63 }
 0x404   :  { %2090 = vmatmul.mubr.bf16.gmra.mxu0 %v799_v26  ;;  %2137 = vmatprep.subr.bf16.mxu0 %v2308_v0 }
 0x407   :  { %2138 = vmatpush3.bf16.msra.mxu0 %v2308_v0 }
 0x408   :  { %2139 = vmatprep.subr.bf16.mxu0 %v2309_v1 }
 0x40b   :  { %2140 = vmatpush3.bf16.msra.mxu0 %v2309_v1 }
 0x4ac   :  { %v2079_v32 = vpop.f32.mrf.mxu0 }
 0x4ae   :  { %v899_v33 = vpop.f32.mrf.mxu0 }
 0x4b0   :  { %v2080_v34 = vpop.f32.mrf.mxu0 }
 0x4b1   :  { %v963_v58 = vpack.c.bf16 %v2080_v34, %v2079_v32 }
 0x4b2   :  { %v902_v35 = vpop.f32.mrf.mxu0 }
 0x4b3   :  { %v962_v62 = vpack.c.bf16 %v902_v35, %v899_v33 }
 0x4b4   :  { %v2083_v36 = vpop.f32.mrf.mxu0 }
 0x4b6   :  { %v915_v37 = vpop.f32.mrf.mxu0 }
 0x4b8   :  { %v2084_v38 = vpop.f32.mrf.mxu0 }
 0x4b9   :  { %v965_v60 = vpack.c.bf16 %v2084_v38, %v2083_v36 }
 0x4ba   :  { %v918_v39 = vpop.f32.mrf.mxu0 }
 0x4bb   :  { %v964_v61 = vpack.c.bf16 %v918_v39, %v915_v37 }
 0x4bc   :  { %v2087_v40 = vpop.f32.mrf.mxu0 }
 0x4be   :  { %v931_v41 = vpop.f32.mrf.mxu0 }
 0x4c0   :  { %v2088_v42 = vpop.f32.mrf.mxu0 }
 0x4c1   :  { %v967_v57 = vpack.c.bf16 %v2088_v42, %v2087_v40 }
 0x4c2   :  { %v934_v43 = vpop.f32.mrf.mxu0 }
 0x4c3   :  { %v966_v59 = vpack.c.bf16 %v934_v43, %v931_v41 }
 0x4c4   :  { %v2091_v44 = vpop.f32.mrf.mxu0 }
 0x4c6   :  { %v947_v45 = vpop.f32.mrf.mxu0 }
 0x4c8   :  { %v2092_v53 = vpop.f32.mrf.mxu0 }
 0x4c9   :  { %v969_v54 = vpack.c.bf16 %v2092_v53, %v2091_v44 }
 0x4ca   :  { %v950_v55 = vpop.f32.mrf.mxu0 }
 0x4cb   :  { %v968_v56 = vpack.c.bf16 %v950_v55, %v947_v45  ;;  %2093 = vmatprep.subr.bf16.mxu1 %v969_v54 }
 0x4cc   :  { %2094 = vmatpush3.bf16.msra.mxu1 %v969_v54 }
 0x4cd   :  { %2095 = vmatprep.subr.bf16.mxu1 %v968_v56 }
 0x4d0   :  { %2096 = vmatpush3.bf16.msra.mxu1 %v968_v56 }
 0x4d1   :  { %2097 = vmatprep.subr.bf16.mxu1 %v967_v57 }
 0x4d4   :  { %2098 = vmatpush3.bf16.msra.mxu1 %v967_v57 }
 0x4d5   :  { %2099 = vmatprep.subr.bf16.mxu1 %v966_v59 }
 0x4d8   :  { %2100 = vmatpush3.bf16.msra.mxu1 %v966_v59 }
 0x4d9   :  { %2101 = vmatprep.subr.bf16.mxu1 %v965_v60 }
 0x4dc   :  { %2102 = vmatpush3.bf16.msra.mxu1 %v965_v60 }
 0x4dd   :  { %2103 = vmatprep.subr.bf16.mxu1 %v964_v61 }
 0x4e0   :  { %2104 = vmatpush3.bf16.msra.mxu1 %v964_v61 }
 0x4e1   :  { %2105 = vmatprep.subr.bf16.mxu1 %v963_v58 }
 0x4e4   :  { %2106 = vmatpush3.bf16.msra.mxu1 %v963_v58 }
 0x4e5   :  { %2107 = vmatprep.subr.bf16.mxu1 %v962_v62 }
 0x4e8   :  { %2108 = vmatpush3.bf16.msra.mxu1 %v962_v62 }
 0x4eb   :  { %2110 = vmatmul.mubr.bf16.vlgmr.msra.gmra.mxu1 %v2499_v46 }
 0x4ec   :  { %2113 = vmatprep.mubr.bf16.mxu1 %v2501_v47 }
 0x4f3   :  { %2114 = vmatmul.mubr.bf16.gmra.mxu1 %v2505_v48 }
 0x4f4   :  { %2117 = vmatprep.mubr.bf16.mxu1 %v2507_v49 }
 0x4fb   :  { %2118 = vmatmul.mubr.bf16.gmra.mxu1 %v2511_v50 }
 0x4fc   :  { %2121 = vmatprep.mubr.bf16.mxu1 %v2513_v51 }
 0x503   :  { %2122 = vmatmul.mubr.bf16.gmra.mxu1 %v2517_v52 }
 0x504   :  { %2173 = vmatprep.mubr.bf16.mxu1 %v2496_v16 }
 0x5ab   :  { %v2111_v2 = vpop.f32.mrf.mxu1 }
 0x5ac   :  { %v1021_v8 = vadd.f32 %v2111_v2, %v1752_v4 }
 0x5ad   :  { %v1012_v3 = vpop.f32.mrf.mxu1 }
 0x5ae   :  { %v1013_v6 = vadd.f32 %v1752_v4, %v1012_v3  ;;  %v1077_v15 = vmax.f32 %v1021_v8, 0.0  ;;  %v2310_v3 = vld [vmem:[#allocation8 + $0xf8] sm:$0xff]  }
 0x5af   :  { %v2112_v5 = vpop.f32.mrf.mxu1  ;;  %2189 = vmatprep.subr.bf16.mxu0 %v2310_v3 }
 0x5b0   :  { %v1024_v7 = vadd.f32 %v2112_v5, %v1752_v4  ;;  %v1075_v13 = vmax.f32 %v1013_v6, 0.0  ;;  %v2311_v5 = vld [vmem:[#allocation8 + $0xf0] sm:$0xff]   ;;  %v2312_v6 = vld [vmem:[#allocation8 + $0xe8] sm:$0xff]  }
 0x5b1   :  { %v1015_v9 = vpop.f32.mrf.mxu1 }
 0x5b2   :  { %v1016_v10 = vadd.f32 %v1752_v4, %v1015_v9  ;;  %v1078_v11 = vmax.f32 %v1024_v7, 0.0  ;;  %v2313_v7 = vld [vmem:[#allocation8 + $0xe0] sm:$0xff]  }
 0x5b3   :  { %v2115_v12 = vpop.f32.mrf.mxu1 }
 0x5b4   :  { %v1076_v14 = vmax.f32 %v1016_v10, 0.0  ;;  %v1092_v19 = vpack.c.bf16 %v1078_v11, %v1077_v15  ;;  %v1037_v23 = vadd.f32 %v2115_v12, %v1752_v4 }
 0x5b5   :  { %v1028_v17 = vpop.f32.mrf.mxu1 }
 0x5b6   :  { %v1091_v18 = vpack.c.bf16 %v1076_v14, %v1075_v13  ;;  %v1029_v21 = vadd.f32 %v1752_v4, %v1028_v17  ;;  %v1081_v31 = vmax.f32 %v1037_v23, 0.0 }
 0x5b7   :  { %v2116_v20 = vpop.f32.mrf.mxu1 }
 0x5b8   :  { %v1040_v22 = vadd.f32 %v2116_v20, %v1752_v4  ;;  %2141 = vmatprep.mubr.bf16.mxu0 %v1091_v18  ;;  %v1079_v29 = vmax.f32 %v1029_v21, 0.0 }
 0x5b9   :  { %v1031_v24 = vpop.f32.mrf.mxu1  ;;  %2142 = vmatmul.mubr.bf16.vlgmr.msra.gmra.mxu0 %v1092_v19 }
 0x5ba   :  { %v1032_v25 = vadd.f32 %v1752_v4, %v1031_v24  ;;  %v1082_v26 = vmax.f32 %v1040_v22, 0.0  ;;  %2190 = vmatpush3.bf16.msra.mxu0 %v2310_v3 }
 0x5bb   :  { %v2119_v27 = vpop.f32.mrf.mxu1  ;;  %2191 = vmatprep.subr.bf16.mxu0 %v2311_v5 }
 0x5bc   :  { %v1080_v30 = vmax.f32 %v1032_v25, 0.0  ;;  %v1094_v33 = vpack.c.bf16 %v1082_v26, %v1081_v31  ;;  %v1053_v37 = vadd.f32 %v2119_v27, %v1752_v4 }
 0x5bd   :  { %v1044_v28 = vpop.f32.mrf.mxu1 }
 0x5be   :  { %v1093_v32 = vpack.c.bf16 %v1080_v30, %v1079_v29  ;;  %v1045_v35 = vadd.f32 %v1752_v4, %v1044_v28  ;;  %v1085_v44 = vmax.f32 %v1053_v37, 0.0  ;;  %2192 = vmatpush3.bf16.msra.mxu0 %v2311_v5 }
 0x5bf   :  { %v2120_v34 = vpop.f32.mrf.mxu1  ;;  %2193 = vmatprep.subr.bf16.mxu0 %v2312_v6 }
 0x5c0   :  { %v1056_v36 = vadd.f32 %v2120_v34, %v1752_v4  ;;  %2145 = vmatprep.mubr.bf16.mxu0 %v1093_v32  ;;  %v1083_v42 = vmax.f32 %v1045_v35, 0.0  ;;  %v2316_v34 = vld [vmem:[#allocation8 + $0xc8] sm:$0xff]  }
 0x5c1   :  { %v1047_v38 = vpop.f32.mrf.mxu1  ;;  %2146 = vmatmul.mubr.bf16.gmra.mxu0 %v1094_v33  ;;  %v2315_v33 = vld [vmem:[#allocation8 + $0xd0] sm:$0xff]  }
 0x5c2   :  { %v1048_v39 = vadd.f32 %v1752_v4, %v1047_v38  ;;  %v1086_v40 = vmax.f32 %v1056_v36, 0.0  ;;  %2194 = vmatpush3.bf16.msra.mxu0 %v2312_v6 }
 0x5c3   :  { %v2123_v41 = vpop.f32.mrf.mxu1  ;;  %2195 = vmatprep.subr.bf16.mxu0 %v2313_v7 }
 0x5c4   :  { %v1084_v43 = vmax.f32 %v1048_v39, 0.0  ;;  %v1096_v54 = vpack.c.bf16 %v1086_v40, %v1085_v44  ;;  %v1069_v59 = vadd.f32 %v2123_v41, %v1752_v4 }
 0x5c5   :  { %v1060_v45 = vpop.f32.mrf.mxu1 }
 0x5c6   :  { %v1095_v53 = vpack.c.bf16 %v1084_v43, %v1083_v42  ;;  %v1061_v56 = vadd.f32 %v1752_v4, %v1060_v45  ;;  %v1089_v0 = vmax.f32 %v1069_v59, 0.0  ;;  %2196 = vmatpush3.bf16.msra.mxu0 %v2313_v7 }
 0x5c7   :  { %v2124_v55 = vpop.f32.mrf.mxu1 }
 0x5c8   :  { %v1072_v57 = vadd.f32 %v2124_v55, %v1752_v4  ;;  %2149 = vmatprep.mubr.bf16.mxu0 %v1095_v53  ;;  %v1087_v62 = vmax.f32 %v1061_v56, 0.0 }
 0x5c9   :  { %v1063_v60 = vpop.f32.mrf.mxu1  ;;  %2150 = vmatmul.mubr.bf16.gmra.mxu0 %v1096_v54 }
 0x5ca   :  { %v1064_v61 = vadd.f32 %v1752_v4, %v1063_v60  ;;  %v1090_v58 = vmax.f32 %v1072_v57, 0.0  ;;  %v2314_v4 = vld [vmem:[#allocation8 + $0xd8] sm:$0xff]  }
 0x5cb   :  { %2197 = vmatprep.subr.bf16.mxu0 %v2314_v4 }
 0x5cc   :  { %v1088_v63 = vmax.f32 %v1064_v61, 0.0  ;;  %v1098_v2 = vpack.c.bf16 %v1090_v58, %v1089_v0  ;;  %2198 = vmatpush3.bf16.msra.mxu0 %v2314_v4 }
 0x5cd   :  { %2199 = vmatprep.subr.bf16.mxu0 %v2315_v33 }
 0x5ce   :  { %v1097_v1 = vpack.c.bf16 %v1088_v63, %v1087_v62 }
 0x5d0   :  { %2153 = vmatprep.mubr.bf16.mxu0 %v1097_v1  ;;  %2200 = vmatpush3.bf16.msra.mxu0 %v2315_v33 }
 0x5d1   :  { %2154 = vmatmul.mubr.bf16.gmra.mxu0 %v1098_v2  ;;  %2201 = vmatprep.subr.bf16.mxu0 %v2316_v34 }
 0x5d4   :  { %2202 = vmatpush3.bf16.msra.mxu0 %v2316_v34 }
 0x679   :  { %v2143_v8 = vpop.f32.mrf.mxu0 }
 0x67b   :  { %v1198_v9 = vpop.f32.mrf.mxu0 }
 0x67d   :  { %v2144_v10 = vpop.f32.mrf.mxu0 }
 0x67e   :  { %v1262_v28 = vpack.c.bf16 %v2144_v10, %v2143_v8 }
 0x67f   :  { %v1201_v11 = vpop.f32.mrf.mxu0 }
 0x680   :  { %v1261_v32 = vpack.c.bf16 %v1201_v11, %v1198_v9 }
 0x681   :  { %v2147_v12 = vpop.f32.mrf.mxu0 }
 0x683   :  { %v1214_v13 = vpop.f32.mrf.mxu0 }
 0x685   :  { %v2148_v14 = vpop.f32.mrf.mxu0 }
 0x686   :  { %v1264_v30 = vpack.c.bf16 %v2148_v14, %v2147_v12 }
 0x687   :  { %v1217_v15 = vpop.f32.mrf.mxu0 }
 0x688   :  { %v1263_v31 = vpack.c.bf16 %v1217_v15, %v1214_v13 }
 0x689   :  { %v2151_v17 = vpop.f32.mrf.mxu0 }
 0x68b   :  { %v1230_v18 = vpop.f32.mrf.mxu0 }
 0x68d   :  { %v2152_v19 = vpop.f32.mrf.mxu0 }
 0x68e   :  { %v1266_v27 = vpack.c.bf16 %v2152_v19, %v2151_v17 }
 0x68f   :  { %v1233_v20 = vpop.f32.mrf.mxu0 }
 0x690   :  { %v1265_v29 = vpack.c.bf16 %v1233_v20, %v1230_v18 }
 0x691   :  { %v2155_v21 = vpop.f32.mrf.mxu0 }
 0x693   :  { %v1246_v22 = vpop.f32.mrf.mxu0 }
 0x695   :  { %v2156_v23 = vpop.f32.mrf.mxu0 }
 0x696   :  { %v1268_v24 = vpack.c.bf16 %v2156_v23, %v2155_v21 }
 0x697   :  { %v1249_v25 = vpop.f32.mrf.mxu0 }
 0x698   :  { %v1267_v26 = vpack.c.bf16 %v1249_v25, %v1246_v22  ;;  %2157 = vmatprep.subr.bf16.mxu1 %v1268_v24 }
 0x699   :  { %2158 = vmatpush3.bf16.msra.mxu1 %v1268_v24 }
 0x69a   :  { %2159 = vmatprep.subr.bf16.mxu1 %v1267_v26 }
 0x69d   :  { %2160 = vmatpush3.bf16.msra.mxu1 %v1267_v26 }
 0x69e   :  { %2161 = vmatprep.subr.bf16.mxu1 %v1266_v27 }
 0x6a1   :  { %2162 = vmatpush3.bf16.msra.mxu1 %v1266_v27 }
 0x6a2   :  { %2163 = vmatprep.subr.bf16.mxu1 %v1265_v29 }
 0x6a5   :  { %2164 = vmatpush3.bf16.msra.mxu1 %v1265_v29 }
 0x6a6   :  { %2165 = vmatprep.subr.bf16.mxu1 %v1264_v30 }
 0x6a9   :  { %2166 = vmatpush3.bf16.msra.mxu1 %v1264_v30 }
 0x6aa   :  { %2167 = vmatprep.subr.bf16.mxu1 %v1263_v31 }
 0x6ad   :  { %2168 = vmatpush3.bf16.msra.mxu1 %v1263_v31 }
 0x6ae   :  { %2169 = vmatprep.subr.bf16.mxu1 %v1262_v28 }
 0x6b1   :  { %2170 = vmatpush3.bf16.msra.mxu1 %v1262_v28 }
 0x6b2   :  { %2171 = vmatprep.subr.bf16.mxu1 %v1261_v32 }
 0x6b5   :  { %2172 = vmatpush3.bf16.msra.mxu1 %v1261_v32 }
 0x6b8   :  { %2174 = vmatmul.mubr.bf16.vlgmr.msra.gmra.mxu1 %v2499_v46  ;;  %v2317_v46 = vld [vmem:[#allocation8 + $0xc0] sm:$0xff]  }
 0x6b9   :  { %2177 = vmatprep.mubr.bf16.mxu1 %v2501_v47  ;;  %2203 = vmatprep.subr.bf16.mxu0 %v2317_v46 }
 0x6ba   :  { %2204 = vmatpush3.bf16.msra.mxu0 %v2317_v46 }
 0x6c0   :  { %2178 = vmatmul.mubr.bf16.gmra.mxu1 %v2505_v48 }
 0x6c1   :  { %2181 = vmatprep.mubr.bf16.mxu1 %v2507_v49  ;;  %v1762_v49 = vld [vmem:[%s2567_s4 + $0x3] ss:$0 sm:$0xff] }
 0x6c8   :  { %2182 = vmatmul.mubr.bf16.gmra.mxu1 %v2511_v50 }
 0x6c9   :  { %2185 = vmatprep.mubr.bf16.mxu1 %v2513_v51 }
 0x6d0   :  { %2186 = vmatmul.mubr.bf16.gmra.mxu1 %v2517_v52 }
 0x6d1   :  { %2237 = vmatprep.mubr.bf16.mxu1 %v2496_v16 }
 0x778   :  { %v2175_v47 = vpop.f32.mrf.mxu1 }
 0x779   :  { %v1320_v35 = vadd.f32 %v2175_v47, %v1762_v49 }
 0x77a   :  { %v1311_v48 = vpop.f32.mrf.mxu1 }
 0x77b   :  { %v1312_v51 = vadd.f32 %v1762_v49, %v1311_v48  ;;  %v1376_v41 = vmax.f32 %v1320_v35, 0.0 }
 0x77c   :  { %v2176_v50 = vpop.f32.mrf.mxu1 }
 0x77d   :  { %v1323_v52 = vadd.f32 %v2176_v50, %v1762_v49  ;;  %v1374_v39 = vmax.f32 %v1312_v51, 0.0 }
 0x77e   :  { %v1314_v16 = vpop.f32.mrf.mxu1 }
 0x77f   :  { %v1315_v36 = vadd.f32 %v1762_v49, %v1314_v16  ;;  %v1377_v37 = vmax.f32 %v1323_v52, 0.0 }
 0x780   :  { %v2179_v38 = vpop.f32.mrf.mxu1 }
 0x781   :  { %v1375_v40 = vmax.f32 %v1315_v36, 0.0  ;;  %v1391_v44 = vpack.c.bf16 %v1377_v37, %v1376_v41  ;;  %v1336_v55 = vadd.f32 %v2179_v38, %v1762_v49 }
 0x782   :  { %v1327_v42 = vpop.f32.mrf.mxu1 }
 0x783   :  { %v1390_v43 = vpack.c.bf16 %v1375_v40, %v1374_v39  ;;  %v1328_v53 = vadd.f32 %v1762_v49, %v1327_v42  ;;  %v1380_v62 = vmax.f32 %v1336_v55, 0.0  ;;  %v2321_v55 = vld [vmem:[#allocation2 + $0x20] sm:$0xff]  }
 0x784   :  { %v2180_v45 = vpop.f32.mrf.mxu1 }
 0x785   :  { %v1339_v54 = vadd.f32 %v2180_v45, %v1762_v49  ;;  %2205 = vmatprep.mubr.bf16.mxu0 %v1390_v43  ;;  %v1378_v61 = vmax.f32 %v1328_v53, 0.0  ;;  %v2318_v45 = vld [vmem:[#allocation2 + $0x8] sm:$0xff]   ;;  %v2319_v53 = vld [vmem:[#allocation2 + $0x10] sm:$0xff]  }
 0x786   :  { %v1330_v56 = vpop.f32.mrf.mxu1  ;;  %2206 = vmatmul.mubr.bf16.vlgmr.msra.gmra.mxu0 %v1391_v44 }
 0x787   :  { %v1331_v57 = vadd.f32 %v1762_v49, %v1330_v56  ;;  %v1381_v59 = vmax.f32 %v1339_v54, 0.0  ;;  %v2320_v54 = vld [vmem:[#allocation2 + $0x18] sm:$0xff]   ;;  %v2322_v56 = vld [vmem:[#allocation2 + $0x28] sm:$0xff]  }
 0x788   :  { %v2183_v60 = vpop.f32.mrf.mxu1 }
 0x789   :  { %v1379_v58 = vmax.f32 %v1331_v57, 0.0  ;;  %v1393_v1 = vpack.c.bf16 %v1381_v59, %v1380_v62  ;;  %v1352_v6 = vadd.f32 %v2183_v60, %v1762_v49  ;;  %v2323_v57 = vld [vmem:[#allocation2 + $0x30] sm:$0xff]   ;;  %v2324_v59 = vld [vmem:[#allocation2 + $0x38] sm:$0xff]   ;;  %v1772_v60 = vld [vmem:[%s2567_s4 + $0x4] ss:$0 sm:$0xff]  ;;  %s2439_s4 = smov [#allocation10]  }
 0x78a   :  { %v1343_v63 = vpop.f32.mrf.mxu1  ;;  %s1694_s21 = sshll.u32 %s2439_s4, 4  ;;  %s1695_s21 = int_to_ptr.vmem [resolvable:$true] %s1694_s21 }
 0x78b   :  { %v1392_v0 = vpack.c.bf16 %v1379_v58, %v1378_v61  ;;  %v1344_v3 = vadd.f32 %v1762_v49, %v1343_v63  ;;  %v1384_v12 = vmax.f32 %v1352_v6, 0.0  ;;  %s2405_s22 = scalar_lea.vmem %s1695_s21, 2048  ;;  %p2410_p7 = scmp.lt.s32.totalorder %s1695_s21, %s1695_s21 }
 0x78c   :  { %v2184_v2 = vpop.f32.mrf.mxu1  ;;  %p2406_p6 = scmp.ne.s32.totalorder %s1695_s21, %s2405_s22  ;;  %p2411_p8 = scmp.lt.s32.totalorder %s2405_s22, %s2405_s22 }
 0x78d   :  { %v1355_v5 = vadd.f32 %v2184_v2, %v1762_v49  ;;  %2209 = vmatprep.mubr.bf16.mxu0 %v1392_v0  ;;  %v1382_v10 = vmax.f32 %v1344_v3, 0.0 }
 0x78e   :  { %v1346_v7 = vpop.f32.mrf.mxu1  ;;  %2210 = vmatmul.mubr.bf16.gmra.mxu0 %v1393_v1  ;;  %p2412_p9 = por %p2411_p8, %p2410_p7 }
 0x78f   :  { %v1347_v4 = vadd.f32 %v1762_v49, %v1346_v7  ;;  %v1385_v8 = vmax.f32 %v1355_v5, 0.0 }
 0x790   :  { %v2187_v9 = vpop.f32.mrf.mxu1  ;;  %p2413_p10 = pnand %p2412_p9, %p2406_p6 }
 0x791   :  { %v1383_v11 = vmax.f32 %v1347_v4, 0.0  ;;  %v1395_v15 = vpack.c.bf16 %v1385_v8, %v1384_v12  ;;  %v1368_v20 = vadd.f32 %v2187_v9, %v1762_v49 }
 0x792   :  { %v1359_v13 = vpop.f32.mrf.mxu1 }
 0x793   :  { %v1394_v14 = vpack.c.bf16 %v1383_v11, %v1382_v10  ;;  %v1360_v18 = vadd.f32 %v1762_v49, %v1359_v13  ;;  %v1388_v26 = vmax.f32 %v1368_v20, 0.0 }
 0x794   :  { %v2188_v17 = vpop.f32.mrf.mxu1 }
 0x795   :  { %v1371_v19 = vadd.f32 %v2188_v17, %v1762_v49  ;;  %2213 = vmatprep.mubr.bf16.mxu0 %v1394_v14  ;;  %v1386_v24 = vmax.f32 %v1360_v18, 0.0 }
 0x796   :  { %v1362_v21 = vpop.f32.mrf.mxu1  ;;  %2214 = vmatmul.mubr.bf16.gmra.mxu0 %v1395_v15 }
 0x797   :  { %v1363_v22 = vadd.f32 %v1762_v49, %v1362_v21  ;;  %v1389_v23 = vmax.f32 %v1371_v19, 0.0 }
 0x799   :  { %v1387_v25 = vmax.f32 %v1363_v22, 0.0  ;;  %v1397_v29 = vpack.c.bf16 %v1389_v23, %v1388_v26 }
 0x79b   :  { %v1396_v27 = vpack.c.bf16 %v1387_v25, %v1386_v24 }
 0x79d   :  { %2217 = vmatprep.mubr.bf16.mxu0 %v1396_v27 }
 0x79e   :  { %2218 = vmatmul.mubr.bf16.gmra.mxu0 %v1397_v29 }
 0x846   :  { %v2207_v30 = vpop.f32.mrf.mxu0 }
 0x848   :  { %v1497_v31 = vpop.f32.mrf.mxu0 }
 0x84a   :  { %v2208_v28 = vpop.f32.mrf.mxu0 }
 0x84b   :  { %v1561_v43 = vpack.c.bf16 %v2208_v28, %v2207_v30 }
 0x84c   :  { %v1500_v32 = vpop.f32.mrf.mxu0 }
 0x84d   :  { %v1560_v44 = vpack.c.bf16 %v1500_v32, %v1497_v31 }
 0x84e   :  { %v2211_v33 = vpop.f32.mrf.mxu0 }
 0x850   :  { %v1513_v34 = vpop.f32.mrf.mxu0 }
 0x852   :  { %v2212_v46 = vpop.f32.mrf.mxu0 }
 0x853   :  { %v1563_v41 = vpack.c.bf16 %v2212_v46, %v2211_v33 }
 0x854   :  { %v1516_v47 = vpop.f32.mrf.mxu0 }
 0x855   :  { %v1562_v42 = vpack.c.bf16 %v1516_v47, %v1513_v34 }
 0x856   :  { %v2215_v48 = vpop.f32.mrf.mxu0 }
 0x858   :  { %v1529_v50 = vpop.f32.mrf.mxu0 }
 0x85a   :  { %v2216_v51 = vpop.f32.mrf.mxu0 }
 0x85b   :  { %v1565_v39 = vpack.c.bf16 %v2216_v51, %v2215_v48 }
 0x85c   :  { %v1532_v49 = vpop.f32.mrf.mxu0 }
 0x85d   :  { %v1564_v40 = vpack.c.bf16 %v1532_v49, %v1529_v50 }
 0x85e   :  { %v2219_v52 = vpop.f32.mrf.mxu0 }
 0x860   :  { %v1545_v35 = vpop.f32.mrf.mxu0 }
 0x862   :  { %v2220_v16 = vpop.f32.mrf.mxu0 }
 0x863   :  { %v1567_v36 = vpack.c.bf16 %v2220_v16, %v2219_v52 }
 0x864   :  { %v1548_v37 = vpop.f32.mrf.mxu0 }
 0x865   :  { %v1566_v38 = vpack.c.bf16 %v1548_v37, %v1545_v35  ;;  %2221 = vmatprep.subr.bf16.mxu1 %v1567_v36 }
 0x866   :  { %2222 = vmatpush3.bf16.msra.mxu1 %v1567_v36 }
 0x867   :  { %2223 = vmatprep.subr.bf16.mxu1 %v1566_v38 }
 0x86a   :  { %2224 = vmatpush3.bf16.msra.mxu1 %v1566_v38 }
 0x86b   :  { %2225 = vmatprep.subr.bf16.mxu1 %v1565_v39 }
 0x86e   :  { %2226 = vmatpush3.bf16.msra.mxu1 %v1565_v39 }
 0x86f   :  { %2227 = vmatprep.subr.bf16.mxu1 %v1564_v40 }
 0x872   :  { %2228 = vmatpush3.bf16.msra.mxu1 %v1564_v40 }
 0x873   :  { %2229 = vmatprep.subr.bf16.mxu1 %v1563_v41 }
 0x876   :  { %2230 = vmatpush3.bf16.msra.mxu1 %v1563_v41 }
 0x877   :  { %2231 = vmatprep.subr.bf16.mxu1 %v1562_v42 }
 0x87a   :  { %2232 = vmatpush3.bf16.msra.mxu1 %v1562_v42 }
 0x87b   :  { %2233 = vmatprep.subr.bf16.mxu1 %v1561_v43 }
 0x87e   :  { %2234 = vmatpush3.bf16.msra.mxu1 %v1561_v43 }
 0x87f   :  { %2235 = vmatprep.subr.bf16.mxu1 %v1560_v44 }
 0x882   :  { %2236 = vmatpush3.bf16.msra.mxu1 %v1560_v44 }
 0x885   :  { %2238 = vmatmul.mubr.bf16.vlgmr.msra.gmra.mxu1 %v2318_v45 }
 0x886   :  { %2241 = vmatprep.mubr.bf16.mxu1 %v2319_v53 }
 0x88d   :  { %2242 = vmatmul.mubr.bf16.gmra.mxu1 %v2320_v54 }
 0x88e   :  { %2245 = vmatprep.mubr.bf16.mxu1 %v2321_v55 }
 0x895   :  { %2246 = vmatmul.mubr.bf16.gmra.mxu1 %v2322_v56 }
 0x896   :  { %2249 = vmatprep.mubr.bf16.mxu1 %v2323_v57 }
 0x89d   :  { %2250 = vmatmul.mubr.bf16.gmra.mxu1 %v2324_v59 }
 0x945   :  { %v2239_v61 = vpop.f32.mrf.mxu1 }
 0x946   :  { %v1619_v58 = vadd.f32 %v2239_v61, %v1772_v60 }
 0x947   :  { %v1610_v62 = vpop.f32.mrf.mxu1 }
 0x948   :  { %1675 = vst [vmem:[#allocation10 + $0x10] sm:$0xff] %v1619_v58  ;;  %v1611_v63 = vadd.f32 %v1772_v60, %v1610_v62 }
 0x949   :  { %v2240_v0 = vpop.f32.mrf.mxu1 }
 0x94a   :  { %1673 = vst [vmem:[#allocation10] sm:$0xff] %v1611_v63  ;;  %v1622_v1 = vadd.f32 %v2240_v0, %v1772_v60 }
 0x94b   :  { %v1613_v2 = vpop.f32.mrf.mxu1 }
 0x94c   :  { %1676 = vst [vmem:[#allocation10 + $0x18] sm:$0xff] %v1622_v1  ;;  %v1614_v3 = vadd.f32 %v1772_v60, %v1613_v2 }
 0x94d   :  { %v2243_v5 = vpop.f32.mrf.mxu1 }
 0x94e   :  { %1674 = vst [vmem:[#allocation10 + $0x8] sm:$0xff] %v1614_v3  ;;  %v1635_v6 = vadd.f32 %v2243_v5, %v1772_v60 }
 0x94f   :  { %v1626_v7 = vpop.f32.mrf.mxu1 }
 0x950   :  { %1679 = vst [vmem:[#allocation10 + $0x30] sm:$0xff] %v1635_v6  ;;  %v1627_v4 = vadd.f32 %v1772_v60, %v1626_v7 }
 0x951   :  { %v2244_v8 = vpop.f32.mrf.mxu1 }
 0x952   :  { %1677 = vst [vmem:[#allocation10 + $0x20] sm:$0xff] %v1627_v4  ;;  %v1638_v9 = vadd.f32 %v2244_v8, %v1772_v60 }
 0x953   :  { %v1629_v10 = vpop.f32.mrf.mxu1 }
 0x954   :  { %1680 = vst [vmem:[#allocation10 + $0x38] sm:$0xff] %v1638_v9  ;;  %v1630_v11 = vadd.f32 %v1772_v60, %v1629_v10 }
 0x955   :  { %v2247_v12 = vpop.f32.mrf.mxu1 }
 0x956   :  { %1678 = vst [vmem:[#allocation10 + $0x28] sm:$0xff] %v1630_v11  ;;  %v1651_v13 = vadd.f32 %v2247_v12, %v1772_v60 }
 0x957   :  { %v1642_v14 = vpop.f32.mrf.mxu1 }
 0x958   :  { %1683 = vst [vmem:[#allocation10 + $0x50] sm:$0xff] %v1651_v13  ;;  %v1643_v15 = vadd.f32 %v1772_v60, %v1642_v14 }
 0x959   :  { %v2248_v17 = vpop.f32.mrf.mxu1 }
 0x95a   :  { %1681 = vst [vmem:[#allocation10 + $0x40] sm:$0xff] %v1643_v15  ;;  %v1654_v18 = vadd.f32 %v2248_v17, %v1772_v60 }
 0x95b   :  { %v1645_v19 = vpop.f32.mrf.mxu1 }
 0x95c   :  { %1684 = vst [vmem:[#allocation10 + $0x58] sm:$0xff] %v1654_v18  ;;  %v1646_v20 = vadd.f32 %v1772_v60, %v1645_v19 }
 0x95d   :  { %v2251_v21 = vpop.f32.mrf.mxu1 }
 0x95e   :  { %1682 = vst [vmem:[#allocation10 + $0x48] sm:$0xff] %v1646_v20  ;;  %v1667_v22 = vadd.f32 %v2251_v21, %v1772_v60 }
 0x95f   :  { %v1658_v23 = vpop.f32.mrf.mxu1 }
 0x960   :  { %1687 = vst [vmem:[#allocation10 + $0x70] sm:$0xff] %v1667_v22  ;;  %v1659_v24 = vadd.f32 %v1772_v60, %v1658_v23 }
 0x961   :  { %v2252_v25 = vpop.f32.mrf.mxu1 }
 0x962   :  { %1685 = vst [vmem:[#allocation10 + $0x60] sm:$0xff] %v1659_v24  ;;  %v1670_v26 = vadd.f32 %v2252_v25, %v1772_v60 }
 0x963   :  { %v1661_v27 = vpop.f32.mrf.mxu1 }
 0x964   :  { %1688 = vst [vmem:[#allocation10 + $0x78] sm:$0xff] %v1670_v26  ;;  %v1662_v29 = vadd.f32 %v1772_v60, %v1661_v27 }
 0x966   :  { %1686 = vst [vmem:[#allocation10 + $0x68] sm:$0xff] %v1662_v29 }
 0x967   :  { %2416 = shalt.err (!%p2413_p10)
}
 0x968   :  { %s2440_s23 = smov 128   ;;  %s2441_s24 = smov 8  }
 0x969   :  { %1700 = dma.vmem_to_hbm [thread:$0]  %s1695_s21, 2048, %s2568_s5, [#allocation4], %s2440_s23, %s2440_s23, %s2441_s24  }
 0x96a   :  { %2431 = dma.done.wait [#allocation4], 2048  }
 0x96b   :  { %2432 = vsyncadd [#allocation4], 4294965248 }
 0x96c   :  { %1704 = vsyncpa [#allocation3], 1 }
 0x96d   :  { %1705 = vsyncpa [#allocation6], 1 }
 0x96e   :  { %1706 = vsyncpa [#allocation9], 1 }
 0x96f   :  { %1707 = vsyncpa [#allocation4], 1 }

</bundles_post_ra>
